<compile_context>
chip_gen: v7x
topology: tpu7x:2x2x1
jax: 0.10.0
libtpu: 0.0.40
codegen_flags: <defaults>
</compile_context>

<pallas_src>
import functools
import math

import jax
import jax.numpy as jnp
from jax.experimental import pallas as pl
from jax.experimental.pallas import tpu as pltpu

_LANES = 128
_SUBLANES = 8
_BASE_BLOCK_ROWS = 4096       # 4096 x 128 x 4B = 2 MiB per f32 block (v5e/v6e)
_BASE_BLOCK_ROWS_V7X = 8192   # 4 MiB f32 blocks: v7x HBM is ~2.3x faster per TC


# ---------------------------------------------------------------------------
# Generation-aware grid parameters
# ---------------------------------------------------------------------------
@functools.lru_cache(maxsize=None)
def _device_kind():
    try:
        return jax.devices()[0].device_kind.lower()
    except Exception:
        return ""


@functools.lru_cache(maxsize=None)
def _grid_params():
    """Returns (num_chunks, base_block_rows) tuned per TPU generation."""
    kind = _device_kind()
    # Single-TensorCore chips (v5e, v6e, and the per-core devices of v2/v3)
    # gain nothing from the leading "parallel" chunk axis -> pure overhead.
    single_core = any(
        t in kind for t in ("v5 lite", "v5e", "v6 lite", "v6e", "v2", "v3"))
    num_chunks = 1 if single_core else 2      # 2 for v7x (2 TCs) / v4 / v5p megacore
    base_rows = _BASE_BLOCK_ROWS_V7X if "7" in kind else _BASE_BLOCK_ROWS
    return num_chunks, base_rows


# ---------------------------------------------------------------------------
# In-kernel helpers
# ---------------------------------------------------------------------------
def _accumulate_rows(acc_ref, vals, rows):
    """Add (rows, 128) f32 `vals` into the (8, 128) accumulator.

    Uses only leading-axis adds (vreg + vreg on the VALU); no cross-lane /
    cross-sublane XLU reduction and no block-sized accumulator RMW.
    """
    full = (rows // _SUBLANES) * _SUBLANES
    if full:
        acc_ref[...] += jnp.sum(
            vals[:full].reshape(full // _SUBLANES, _SUBLANES, _LANES), axis=0)
    if rows > full:  # cold path: tiny single-block arrays with rows % 8 != 0
        rem = rows - full
        acc_ref[pl.ds(0, rem), :] = acc_ref[pl.ds(0, rem), :] + vals[full:]


def _make_sse_kernel(total_rows, block_rows, blocks_per_chunk,
                     first_masked_block, needs_mask):
    """sum((x - t)^2) over a (rows, 128) slab, chunked + tiled on a 2-D grid."""

    def kernel(x_ref, t_ref, o_ref, acc_ref):
        i = pl.program_id(1)

        @pl.when(i == 0)
        def _():
            acc_ref[...] = jnp.zeros_like(acc_ref)

        d = x_ref[...].astype(jnp.float32) - t_ref[...].astype(jnp.float32)

        if needs_mask:
            blk = pl.program_id(0) * blocks_per_chunk + i

            @pl.when(blk < first_masked_block)          # interior blocks: no mask work
            def _():
                _accumulate_rows(acc_ref, d * d, block_rows)

            @pl.when(blk >= first_masked_block)         # partial tail / overshoot blocks
            def _():
                row = jax.lax.broadcasted_iota(jnp.int32, (block_rows, _LANES), 0)
                dm = jnp.where(blk * block_rows + row < total_rows, d, 0.0)
                _accumulate_rows(acc_ref, dm * dm, block_rows)
        else:
            _accumulate_rows(acc_ref, d * d, block_rows)

        @pl.when(i == pl.num_programs(1) - 1)
        def _():
            o_ref[...] = acc_ref[...]

    return kernel


def _make_logsum_kernel(total_rows, block_rows, blocks_per_chunk,
                        first_masked_block, needs_mask):
    """sum(log(p)) over a (rows, 128) slab, chunked + tiled on a 2-D grid."""

    def kernel(p_ref, o_ref, acc_ref):
        i = pl.program_id(1)

        @pl.when(i == 0)
        def _():
            acc_ref[...] = jnp.zeros_like(acc_ref)

        p = p_ref[...].astype(jnp.float32)

        if needs_mask:
            blk = pl.program_id(0) * blocks_per_chunk + i

            @pl.when(blk < first_masked_block)
            def _():
                _accumulate_rows(acc_ref, jnp.log(p), block_rows)

            @pl.when(blk >= first_masked_block)
            def _():
                row = jax.lax.broadcasted_iota(jnp.int32, (block_rows, _LANES), 0)
                pm = jnp.where(blk * block_rows + row < total_rows, p, 1.0)
                _accumulate_rows(acc_ref, jnp.log(pm), block_rows)   # log(1) == 0
        else:
            _accumulate_rows(acc_ref, jnp.log(p), block_rows)

        @pl.when(i == pl.num_programs(1) - 1)
        def _():
            o_ref[...] = acc_ref[...]

    return kernel


# ---------------------------------------------------------------------------
# Shared tiled-reduction driver
# ---------------------------------------------------------------------------
def _to_slab(flat, pad_value):
    """View a flat array as a lane-dense (rows, 128) slab in its native dtype."""
    n = flat.shape[0]
    rem = n % _LANES
    if rem:
        # TODO(synk): unaligned numel pays one HBM copy here; a copy-free path
        # would need manual-DMA element masking of the final partial row.
        flat = jnp.pad(flat, (0, _LANES - rem), constant_values=pad_value)
    return flat.reshape(flat.shape[0] // _LANES, _LANES)


def _tiled_reduce(kernel_factory, slabs, block_rows_cap=None):
    num_chunks_pref, base_rows = _grid_params()
    if block_rows_cap is None:
        # dtype-aware block rows: keep ~base_rows*128*4 bytes per input block
        # so bf16/fp8 inputs amortize the per-step overhead over the same bytes.
        max_itemsize = max(jnp.dtype(s.dtype).itemsize for s in slabs)
        block_rows_cap = base_rows * max(1, 4 // max_itemsize)
    block_rows_cap = max(_SUBLANES, (block_rows_cap // _SUBLANES) * _SUBLANES)

    total_rows = slabs[0].shape[0]
    block_rows = min(total_rows, block_rows_cap)
    total_blocks = pl.cdiv(total_rows, block_rows)
    num_chunks = num_chunks_pref if total_blocks >= num_chunks_pref else 1
    bpc = pl.cdiv(total_blocks, num_chunks)        # blocks per chunk
    logical_blocks = num_chunks * bpc
    last_block = total_blocks - 1

    # First logical block whose rows reach past total_rows (partial tail block,
    # plus overshoot blocks from the chunk split that get clamped onto the last
    # real block). Only those blocks pay the iota/compare/select mask.
    row_aligned = (total_rows % block_rows) == 0
    first_masked_block = total_blocks if row_aligned else total_rows // block_rows
    needs_mask = first_masked_block < logical_blocks

    def in_index_map(c, i):
        # Clamp overshoot blocks of the last chunk back in-bounds; the in-kernel
        # row mask zeroes their contribution.
        return (jnp.minimum(c * bpc + i, last_block), 0)

    in_specs = [pl.BlockSpec((block_rows, _LANES), in_index_map) for _ in slabs]

    out = pl.pallas_call(
        kernel_factory(total_rows, block_rows, bpc, first_masked_block, needs_mask),
        out_shape=jax.ShapeDtypeStruct((num_chunks * _SUBLANES, _LANES), jnp.float32),
        grid_spec=pltpu.PrefetchScalarGridSpec(
            num_scalar_prefetch=0,
            grid=(num_chunks, bpc),
            in_specs=in_specs,
            out_specs=pl.BlockSpec((_SUBLANES, _LANES), lambda c, i: (c, 0)),
            scratch_shapes=[pltpu.VMEM((_SUBLANES, _LANES), jnp.float32)],
        ),
        compiler_params=pltpu.CompilerParams(
            dimension_semantics=("parallel", "arbitrary")),
    )(*slabs)
    # Each chunk's (8, 128) vreg of partial sums -> final scalar (tiny, in JAX).
    return jnp.sum(out)


# ---------------------------------------------------------------------------
# Wrappers
# ---------------------------------------------------------------------------
def _sum_squared_error(x_hat, target, block_rows_cap=None):
    return _tiled_reduce(
        _make_sse_kernel,
        [_to_slab(jnp.ravel(x_hat), 0.0), _to_slab(jnp.ravel(target), 0.0)],
        block_rows_cap)


def _sum_log(p, block_rows_cap=None):
    return _tiled_reduce(
        _make_logsum_kernel, [_to_slab(jnp.ravel(p), 1.0)], block_rows_cap)


def rate_distortion_loss(output, target, lmbda=0.01):
    """JAX/Pallas equivalent of RateDistortionLoss.forward.

    output: dict with
      'x_hat': (N, C, H, W) reconstruction
      'likelihoods': dict of arrays of likelihood values (any shapes)
    target: (N, C, H, W)
    """
    N, _, H, W = target.shape
    num_pixels = N * H * W

    # bpp_loss = sum_k sum(log(p_k)) / (-ln(2) * num_pixels)
    # One kernel launch per likelihood tensor (no HBM concat copy).
    log_sum = sum(_sum_log(p) for p in output["likelihoods"].values())
    bpp_loss = log_sum / jnp.float32(-math.log(2) * num_pixels)

    # mse_loss = mean((x_hat - target)^2)  (nn.MSELoss default reduction='mean')
    n_elems = math.prod(target.shape)
    mse_loss = _sum_squared_error(output["x_hat"], target) / jnp.float32(n_elems)

    loss = lmbda * (255.0 ** 2) * mse_loss + bpp_loss
    return {"bpp_loss": bpp_loss, "mse_loss": mse_loss, "loss": loss}


# ---------------------------------------------------------------------------
# Reference (pure JAX) for sanity check
# ---------------------------------------------------------------------------
def _rate_distortion_loss_ref(output, target, lmbda=0.01):
    N, _, H, W = target.shape
    num_pixels = N * H * W
    bpp = sum(
        jnp.sum(jnp.log(lk.astype(jnp.float32))) / (-math.log(2) * num_pixels)
        for lk in output["likelihoods"].values()
    )
    mse = jnp.mean(
        (output["x_hat"].astype(jnp.float32) - target.astype(jnp.float32)) ** 2)
    return {"bpp_loss": bpp, "mse_loss": mse,
            "loss": lmbda * 255.0 ** 2 * mse + bpp}


if __name__ == "__main__":
    key = jax.random.PRNGKey(0)
    k1, k2, k3, k4 = jax.random.split(key, 4)

    N, C, H, W = 2, 4, 16, 16
    target = jax.random.normal(k1, (N, C, H, W), dtype=jnp.float32)
    x_hat = target + 0.05 * jax.random.normal(k2, (N, C, H, W), dtype=jnp.float32)

    # Likelihoods (e.g. 'y' and 'z' latents in a hyperprior model), values in (0, 1].
    lik_y = jax.random.uniform(k3, (N, 8, 4, 4), dtype=jnp.float32,
                               minval=1e-3, maxval=1.0)
    lik_z = jax.random.uniform(k4, (N, 8, 2, 2), dtype=jnp.float32,
                               minval=1e-3, maxval=1.0)

    output = {"x_hat": x_hat, "likelihoods": {"y": lik_y, "z": lik_z}}

    loss_fn = jax.jit(rate_distortion_loss)
    out = loss_fn(output, target)
    out = jax.tree_util.tree_map(jax.block_until_ready, out)

    ref = _rate_distortion_loss_ref(output, target, lmbda=0.01)
    for k in ("bpp_loss", "mse_loss", "loss"):
        assert abs(float(out[k]) - float(ref[k])) <= 1e-4 * max(1.0, abs(float(ref[k]))), (
            k, float(out[k]), float(ref[k]))

    # Extra coverage at small block size: multi-block grid, chunk split with
    # overshoot clamping, partial tail-block masking, and the pad-to-128 path.
    ka, kb, kp = jax.random.split(jax.random.PRNGKey(1), 3)
    a = jax.random.normal(ka, (17, 128), dtype=jnp.float32)
    b = jax.random.normal(kb, (17, 128), dtype=jnp.float32)
    sse = jax.block_until_ready(_sum_squared_error(a, b, block_rows_cap=8))
    sse_ref = float(jnp.sum((a - b) ** 2))
    assert abs(float(sse) - sse_ref) <= 1e-3 * max(1.0, abs(sse_ref)), (float(sse), sse_ref)

    p = jax.random.uniform(kp, (40, 130), dtype=jnp.float32, minval=1e-3, maxval=1.0)
    ls = jax.block_until_ready(_sum_log(p, block_rows_cap=8))
    ls_ref = float(jnp.sum(jnp.log(p)))
    assert abs(float(ls) - ls_ref) <= 1e-3 * max(1.0, abs(ls_ref)), (float(ls), ls_ref)

    # bf16 path (dtype-aware block rows, in-kernel f32 cast).
    a16 = a.astype(jnp.bfloat16)
    b16 = b.astype(jnp.bfloat16)
    sse16 = jax.block_until_ready(_sum_squared_error(a16, b16))
    sse16_ref = float(jnp.sum(
        (a16.astype(jnp.float32) - b16.astype(jnp.float32)) ** 2))
    assert abs(float(sse16) - sse16_ref) <= 1e-3 * max(1.0, abs(sse16_ref)), (
        float(sse16), sse16_ref)

    print("KERNEL_OK")
</pallas_src>

<mosaic_0001>
module attributes {stable_mosaic.version = 11 : i64} {
  func.func @kernel(%arg0: i32, %arg1: i32, %arg2: memref<2x128xf32, #tpu.memory_space<vmem>>, %arg3: memref<8x128xf32, #tpu.memory_space<vmem>>, %arg4: memref<8x128xf32, #tpu.memory_space<vmem>>) attributes {dimension_semantics = [#tpu.dimension_semantics<parallel>, #tpu.dimension_semantics<arbitrary>], iteration_bounds = array<i64: 1, 1>, scalar_prefetch = 0 : i64, scratch_operands = 1 : i64, tpu.core_type = #tpu.core_type<tc>, window_params = [{transform_indices = @transform_0, window_bounds = array<i64: 2, 128>}, {transform_indices = @transform_1, window_bounds = array<i64: 8, 128>}]} {
    %c0_i32 = arith.constant 0 : i32
    %0 = arith.cmpi eq, %arg1, %c0_i32 : i32
    %1 = arith.extui %0 : i1 to i32
    %c0_i32_0 = arith.constant 0 : i32
    %2 = arith.cmpi ne, %1, %c0_i32_0 : i32
    scf.if %2 {
      %cst = arith.constant 0.000000e+00 : f32
      %11 = vector.broadcast %cst : f32 to vector<8x128xf32>
      %c0_8 = arith.constant 0 : index
      %c0_9 = arith.constant 0 : index
      %12 = vector.load %arg4[%c0_8, %c0_9] : memref<8x128xf32, #tpu.memory_space<vmem>>, vector<8x128xf32>
      tpu.vector_store %arg4[%c0_8, %c0_9], %11 {strides = array<i32>} : memref<8x128xf32, #tpu.memory_space<vmem>>, vector<8x128xf32>,
    } else {
    }
    %c0 = arith.constant 0 : index
    %c0_1 = arith.constant 0 : index
    %3 = vector.load %arg2[%c0, %c0_1] : memref<2x128xf32, #tpu.memory_space<vmem>>, vector<2x128xf32>
    %4 = math.log %3 : vector<2x128xf32>
    %c0_2 = arith.constant 0 : index
    %c0_3 = arith.constant 0 : index
    %5 = vector.load %arg4[%c0_2, %c0_3] : memref<8x128xf32, #tpu.memory_space<vmem>>, vector<2x128xf32>
    %6 = arith.addf %5, %4 : vector<2x128xf32>
    %c0_4 = arith.constant 0 : index
    %c0_5 = arith.constant 0 : index
    %7 = vector.load %arg4[%c0_4, %c0_5] : memref<8x128xf32, #tpu.memory_space<vmem>>, vector<2x128xf32>
    tpu.vector_store %arg4[%c0_4, %c0_5], %6 {strides = array<i32>} : memref<8x128xf32, #tpu.memory_space<vmem>>, vector<2x128xf32>,
    %c0_i32_6 = arith.constant 0 : i32
    %8 = arith.cmpi eq, %arg1, %c0_i32_6 : i32
    %9 = arith.extui %8 : i1 to i32
    %c0_i32_7 = arith.constant 0 : i32
    %10 = arith.cmpi ne, %9, %c0_i32_7 : i32
    scf.if %10 {
      %c0_8 = arith.constant 0 : index
      %c0_9 = arith.constant 0 : index
      %11 = vector.load %arg4[%c0_8, %c0_9] : memref<8x128xf32, #tpu.memory_space<vmem>>, vector<8x128xf32>
      %c0_10 = arith.constant 0 : index
      %c0_11 = arith.constant 0 : index
      %12 = vector.load %arg3[%c0_10, %c0_11] : memref<8x128xf32, #tpu.memory_space<vmem>>, vector<8x128xf32>
      tpu.vector_store %arg3[%c0_10, %c0_11], %11 {strides = array<i32>} : memref<8x128xf32, #tpu.memory_space<vmem>>, vector<8x128xf32>,
    } else {
    }
    return
  }
  func.func @transform_0(%arg0: i32, %arg1: i32) -> (i32, i32) {
    %c1_i32 = arith.constant 1 : i32
    %0 = arith.muli %arg0, %c1_i32 : i32
    %1 = arith.addi %0, %arg1 : i32
    %c0_i32 = arith.constant 0 : i32
    %2 = arith.minsi %1, %c0_i32 : i32
    %c0_i32_0 = arith.constant 0 : i32
    %c0_i32_1 = arith.constant 0 : i32
    return %2, %c0_i32_0 : i32, i32
  }
  func.func @transform_1(%arg0: i32, %arg1: i32) -> (i32, i32) {
    %c0_i32 = arith.constant 0 : i32
    %c0_i32_0 = arith.constant 0 : i32
    return %arg0, %c0_i32 : i32, i32
  }
}

module attributes {stable_mosaic.version = 11 : i64} {
  func.func @kernel(%arg0: i32, %arg1: i32, %arg2: memref<1x128xf32, #tpu.memory_space<vmem>>, %arg3: memref<8x128xf32, #tpu.memory_space<vmem>>, %arg4: memref<8x128xf32, #tpu.memory_space<vmem>>) attributes {dimension_semantics = [#tpu.dimension_semantics<parallel>, #tpu.dimension_semantics<arbitrary>], iteration_bounds = array<i64: 1, 1>, scalar_prefetch = 0 : i64, scratch_operands = 1 : i64, tpu.core_type = #tpu.core_type<tc>, window_params = [{transform_indices = @transform_0, window_bounds = array<i64: 1, 128>}, {transform_indices = @transform_1, window_bounds = array<i64: 8, 128>}]} {
    %c0_i32 = arith.constant 0 : i32
    %0 = arith.cmpi eq, %arg1, %c0_i32 : i32
    %1 = arith.extui %0 : i1 to i32
    %c0_i32_0 = arith.constant 0 : i32
    %2 = arith.cmpi ne, %1, %c0_i32_0 : i32
    scf.if %2 {
      %cst = arith.constant 0.000000e+00 : f32
      %11 = vector.broadcast %cst : f32 to vector<8x128xf32>
      %c0_8 = arith.constant 0 : index
      %c0_9 = arith.constant 0 : index
      %12 = vector.load %arg4[%c0_8, %c0_9] : memref<8x128xf32, #tpu.memory_space<vmem>>, vector<8x128xf32>
      tpu.vector_store %arg4[%c0_8, %c0_9], %11 {strides = array<i32>} : memref<8x128xf32, #tpu.memory_space<vmem>>, vector<8x128xf32>,
    } else {
    }
    %c0 = arith.constant 0 : index
    %c0_1 = arith.constant 0 : index
    %3 = vector.load %arg2[%c0, %c0_1] : memref<1x128xf32, #tpu.memory_space<vmem>>, vector<1x128xf32>
    %4 = math.log %3 : vector<1x128xf32>
    %c0_2 = arith.constant 0 : index
    %c0_3 = arith.constant 0 : index
    %5 = vector.load %arg4[%c0_2, %c0_3] : memref<8x128xf32, #tpu.memory_space<vmem>>, vector<1x128xf32>
    %6 = arith.addf %5, %4 : vector<1x128xf32>
    %c0_4 = arith.constant 0 : index
    %c0_5 = arith.constant 0 : index
    %7 = vector.load %arg4[%c0_4, %c0_5] : memref<8x128xf32, #tpu.memory_space<vmem>>, vector<1x128xf32>
    tpu.vector_store %arg4[%c0_4, %c0_5], %6 {strides = array<i32>} : memref<8x128xf32, #tpu.memory_space<vmem>>, vector<1x128xf32>,
    %c0_i32_6 = arith.constant 0 : i32
    %8 = arith.cmpi eq, %arg1, %c0_i32_6 : i32
    %9 = arith.extui %8 : i1 to i32
    %c0_i32_7 = arith.constant 0 : i32
    %10 = arith.cmpi ne, %9, %c0_i32_7 : i32
    scf.if %10 {
      %c0_8 = arith.constant 0 : index
      %c0_9 = arith.constant 0 : index
      %11 = vector.load %arg4[%c0_8, %c0_9] : memref<8x128xf32, #tpu.memory_space<vmem>>, vector<8x128xf32>
      %c0_10 = arith.constant 0 : index
      %c0_11 = arith.constant 0 : index
      %12 = vector.load %arg3[%c0_10, %c0_11] : memref<8x128xf32, #tpu.memory_space<vmem>>, vector<8x128xf32>
      tpu.vector_store %arg3[%c0_10, %c0_11], %11 {strides = array<i32>} : memref<8x128xf32, #tpu.memory_space<vmem>>, vector<8x128xf32>,
    } else {
    }
    return
  }
  func.func @transform_0(%arg0: i32, %arg1: i32) -> (i32, i32) {
    %c1_i32 = arith.constant 1 : i32
    %0 = arith.muli %arg0, %c1_i32 : i32
    %1 = arith.addi %0, %arg1 : i32
    %c0_i32 = arith.constant 0 : i32
    %2 = arith.minsi %1, %c0_i32 : i32
    %c0_i32_0 = arith.constant 0 : i32
    %c0_i32_1 = arith.constant 0 : i32
    return %2, %c0_i32_0 : i32, i32
  }
  func.func @transform_1(%arg0: i32, %arg1: i32) -> (i32, i32) {
    %c0_i32 = arith.constant 0 : i32
    %c0_i32_0 = arith.constant 0 : i32
    return %arg0, %c0_i32 : i32, i32
  }
}

module attributes {stable_mosaic.version = 11 : i64} {
  func.func @kernel(%arg0: i32, %arg1: i32, %arg2: memref<16x128xf32, #tpu.memory_space<vmem>>, %arg3: memref<16x128xf32, #tpu.memory_space<vmem>>, %arg4: memref<8x128xf32, #tpu.memory_space<vmem>>, %arg5: memref<8x128xf32, #tpu.memory_space<vmem>>) attributes {dimension_semantics = [#tpu.dimension_semantics<parallel>, #tpu.dimension_semantics<arbitrary>], iteration_bounds = array<i64: 1, 1>, scalar_prefetch = 0 : i64, scratch_operands = 1 : i64, tpu.core_type = #tpu.core_type<tc>, window_params = [{transform_indices = @transform_0, window_bounds = array<i64: 16, 128>}, {transform_indices = @transform_1, window_bounds = array<i64: 16, 128>}, {transform_indices = @transform_2, window_bounds = array<i64: 8, 128>}]} {
    %c0_i32 = arith.constant 0 : i32
    %0 = arith.cmpi eq, %arg1, %c0_i32 : i32
    %1 = arith.extui %0 : i1 to i32
    %c0_i32_0 = arith.constant 0 : i32
    %2 = arith.cmpi ne, %1, %c0_i32_0 : i32
    scf.if %2 {
      %cst_10 = arith.constant 0.000000e+00 : f32
      %15 = vector.broadcast %cst_10 : f32 to vector<8x128xf32>
      %c0_11 = arith.constant 0 : index
      %c0_12 = arith.constant 0 : index
      %16 = vector.load %arg5[%c0_11, %c0_12] : memref<8x128xf32, #tpu.memory_space<vmem>>, vector<8x128xf32>
      tpu.vector_store %arg5[%c0_11, %c0_12], %15 {strides = array<i32>} : memref<8x128xf32, #tpu.memory_space<vmem>>, vector<8x128xf32>,
    } else {
    }
    %c0 = arith.constant 0 : index
    %c0_1 = arith.constant 0 : index
    %3 = vector.load %arg2[%c0, %c0_1] : memref<16x128xf32, #tpu.memory_space<vmem>>, vector<16x128xf32>
    %c0_2 = arith.constant 0 : index
    %c0_3 = arith.constant 0 : index
    %4 = vector.load %arg3[%c0_2, %c0_3] : memref<16x128xf32, #tpu.memory_space<vmem>>, vector<16x128xf32>
    %5 = arith.subf %3, %4 : vector<16x128xf32>
    %6 = arith.mulf %5, %5 : vector<16x128xf32>
    %c0_4 = arith.constant 0 : index
    %c0_5 = arith.constant 0 : index
    %7 = vector.load %arg5[%c0_4, %c0_5] : memref<8x128xf32, #tpu.memory_space<vmem>>, vector<8x128xf32>
    %8 = vector.shape_cast %6 : vector<16x128xf32> to vector<2x8x128xf32>
    %cst = arith.constant dense<0.000000e+00> : vector<8x128xf32>
    %9 = vector.multi_reduction <add>, %8, %cst [0] : vector<2x8x128xf32> to vector<8x128xf32>
    %10 = arith.addf %7, %9 : vector<8x128xf32>
    %c0_6 = arith.constant 0 : index
    %c0_7 = arith.constant 0 : index
    %11 = vector.load %arg5[%c0_6, %c0_7] : memref<8x128xf32, #tpu.memory_space<vmem>>, vector<8x128xf32>
    tpu.vector_store %arg5[%c0_6, %c0_7], %10 {strides = array<i32>} : memref<8x128xf32, #tpu.memory_space<vmem>>, vector<8x128xf32>,
    %c0_i32_8 = arith.constant 0 : i32
    %12 = arith.cmpi eq, %arg1, %c0_i32_8 : i32
    %13 = arith.extui %12 : i1 to i32
    %c0_i32_9 = arith.constant 0 : i32
    %14 = arith.cmpi ne, %13, %c0_i32_9 : i32
    scf.if %14 {
      %c0_10 = arith.constant 0 : index
      %c0_11 = arith.constant 0 : index
      %15 = vector.load %arg5[%c0_10, %c0_11] : memref<8x128xf32, #tpu.memory_space<vmem>>, vector<8x128xf32>
      %c0_12 = arith.constant 0 : index
      %c0_13 = arith.constant 0 : index
      %16 = vector.load %arg4[%c0_12, %c0_13] : memref<8x128xf32, #tpu.memory_space<vmem>>, vector<8x128xf32>
      tpu.vector_store %arg4[%c0_12, %c0_13], %15 {strides = array<i32>} : memref<8x128xf32, #tpu.memory_space<vmem>>, vector<8x128xf32>,
    } else {
    }
    return
  }
  func.func @transform_0(%arg0: i32, %arg1: i32) -> (i32, i32) {
    %c1_i32 = arith.constant 1 : i32
    %0 = arith.muli %arg0, %c1_i32 : i32
    %1 = arith.addi %0, %arg1 : i32
    %c0_i32 = arith.constant 0 : i32
    %2 = arith.minsi %1, %c0_i32 : i32
    %c0_i32_0 = arith.constant 0 : i32
    %c0_i32_1 = arith.constant 0 : i32
    return %2, %c0_i32_0 : i32, i32
  }
  func.func @transform_1(%arg0: i32, %arg1: i32) -> (i32, i32) {
    %c1_i32 = arith.constant 1 : i32
    %0 = arith.muli %arg0, %c1_i32 : i32
    %1 = arith.addi %0, %arg1 : i32
    %c0_i32 = arith.constant 0 : i32
    %2 = arith.minsi %1, %c0_i32 : i32
    %c0_i32_0 = arith.constant 0 : i32
    %c0_i32_1 = arith.constant 0 : i32
    return %2, %c0_i32_0 : i32, i32
  }
  func.func @transform_2(%arg0: i32, %arg1: i32) -> (i32, i32) {
    %c0_i32 = arith.constant 0 : i32
    %c0_i32_0 = arith.constant 0 : i32
    return %arg0, %c0_i32 : i32, i32
  }
}

</mosaic_0001>

<bundles_post_ra>
// kernel: rate_distortion_loss.3
= control target key start
LH: loop header
LB: loop body
LE: loop exit
PB: predicated region body
PF: predicated region fallthrough
CT: control target
= control target key end

     0   :  { %v64_v0 = vmov 0.0   ;;  %s81_s0 = inlined_call_operand.vmem [shape: f32[2,128], index: 0, kind: input, shape index: {}]   ;;  %s82_s1 = inlined_call_operand.vmem [shape: f32[8,128], index: 1, kind: output, shape index: {}]  }
   0x1   :  { %39 = vst [vmem:[#allocation2] sm:$0xff] %v64_v0  ;;  %v40_v1 = vld [vmem:[%s81_s0] sm:$0x3] }
   0x2   :  { %62 = vlog2.f32 %v40_v1 }
   0x8   :  { %v43_v3 = vld [vmem:[#allocation2] sm:$0x3] }
   0xc   :  { %v63_v2 = vpop.eup %62 }
   0xd   :  { %v42_v4 = vmul.f32 0.6931472, %v63_v2 }
   0xf   :  { %v44_v5 = vadd.f32 %v43_v3, %v42_v4 }
  0x11   :  { %45 = vst [vmem:[#allocation2] sm:$0x3] %v44_v5 }
  0x18   :  { %v49_v6 = vld [vmem:[#allocation2] sm:$0xff] }
  0x19   :  { %50 = vst [vmem:[%s82_s1] sm:$0xff] %v49_v6 }

// kernel: rate_distortion_loss.4
= control target key start
LH: loop header
LB: loop body
LE: loop exit
PB: predicated region body
PF: predicated region fallthrough
CT: control target
= control target key end

     0   :  { %v58_v0 = vmov 0.0   ;;  %s75_s0 = inlined_call_operand.vmem [shape: f32[1,128], index: 0, kind: input, shape index: {}]   ;;  %s76_s1 = inlined_call_operand.vmem [shape: f32[8,128], index: 1, kind: output, shape index: {}]  }
   0x1   :  { %36 = vst [vmem:[#allocation2] sm:$0xff] %v58_v0  ;;  %v37_v1 = vld [vmem:[%s75_s0] sm:$0x1] }
   0x2   :  { %56 = vlog2.f32 %v37_v1 }
   0x8   :  { %v40_v3 = vld [vmem:[#allocation2] sm:$0x1] }
   0xc   :  { %v57_v2 = vpop.eup %56 }
   0xd   :  { %v39_v4 = vmul.f32 0.6931472, %v57_v2 }
   0xf   :  { %v41_v5 = vadd.f32 %v40_v3, %v39_v4 }
  0x11   :  { %42 = vst [vmem:[#allocation2] sm:$0x1] %v41_v5 }
  0x18   :  { %v46_v6 = vld [vmem:[#allocation2] sm:$0xff] }
  0x19   :  { %47 = vst [vmem:[%s76_s1] sm:$0xff] %v46_v6 }

// kernel: rate_distortion_loss.5
= control target key start
LH: loop header
LB: loop body
LE: loop exit
PB: predicated region body
PF: predicated region fallthrough
CT: control target
= control target key end

     0   :  { %s143_s0 = inlined_call_operand.vmem [shape: f32[16,128], index: 0, kind: input, shape index: {}]   ;;  %s144_s1 = inlined_call_operand.vmem [shape: f32[16,128], index: 1, kind: input, shape index: {}]   ;;  %s145_s2 = inlined_call_operand.vmem [shape: f32[8,128], index: 2, kind: output, shape index: {}]  }
   0x1   :  { %v80_v0 = vld [vmem:[%s143_s0] sm:$0xff]  ;;  %v81_v1 = vld [vmem:[%s143_s0 + $0x8] sm:$0xff] }
   0x2   :  { %v82_v2 = vld [vmem:[%s144_s1] sm:$0xff]  ;;  %v83_v3 = vld [vmem:[%s144_s1 + $0x8] sm:$0xff] }
   0x3   :  { %v84_v4 = vsub.f32 %v80_v0, %v82_v2  ;;  %v85_v5 = vsub.f32 %v81_v1, %v83_v3 }
   0x5   :  { %v86_v6 = vmul.f32 %v84_v4, %v84_v4  ;;  %v87_v7 = vmul.f32 %v85_v5, %v85_v5 }
   0x7   :  { %v89_v8 = vadd.f32 %v87_v7, %v86_v6 }
   0x9   :  { %96 = vst [vmem:[%s145_s2] sm:$0xff] %v89_v8 }

</bundles_post_ra>
